<compile_context>
chip_gen: v6e
topology: v6e:2x2x1
jax: 0.10.0
libtpu: 0.0.40
codegen_flags: <defaults>
</compile_context>

<pallas_src>
import functools

import jax
import jax.numpy as jnp
from jax.experimental import pallas as pl
from jax.experimental.pallas import tpu as pltpu

EPS = 1e-5
LANE = 128


# ----------------------------------------------------------------------------
# small helpers
# ----------------------------------------------------------------------------
def _round_up(x, m):
    return ((x + m - 1) // m) * m


def _pad2d(a, rows=None, cols=None):
    r, c = a.shape
    pr = 0 if rows is None else rows - r
    pc = 0 if cols is None else cols - c
    if pr == 0 and pc == 0:
        return a
    return jnp.pad(a, ((0, pr), (0, pc)))


def _vmem_limit(nbytes):
    # headroom above the double-buffered estimate, clamped to be safe on
    # v5e/v6e (128 MiB) and v7x (64 MiB physical).
    return int(min(max(nbytes + (4 << 20), 16 << 20), 48 << 20))


# ----------------------------------------------------------------------------
# Pallas kernels
# ----------------------------------------------------------------------------
def _make_conv_stats_kernel(n_branches):
    """Phase 1: per M-tile matmul(s) + global per-channel sum / sum-of-squares."""

    def kernel(*refs):
        ins, outs = refs[:2 * n_branches], refs[2 * n_branches:]
        first = pl.program_id(0) == 0

        def branch(p_ref, w_ref, z_ref, st_ref):
            # conv tile as a single MXU matmul: bf16 operands, f32 accumulate.
            z = jnp.dot(p_ref[...], w_ref[...],
                        preferred_element_type=jnp.float32)
            z_ref[...] = z
            # one-pass stats: accumulate sum(z) and sum(z*z) per channel.
            part = jnp.concatenate(
                [jnp.sum(z, axis=0, keepdims=True),
                 jnp.sum(z * z, axis=0, keepdims=True)], axis=0)

            @pl.when(first)
            def _():
                st_ref[...] = jnp.zeros_like(st_ref)

            st_ref[...] += part

        for b in range(n_branches):
            branch(ins[2 * b], ins[2 * b + 1], outs[2 * b], outs[2 * b + 1])

    return kernel


def _make_apply_kernel(n_branches, add_identity, apply_relu):
    """Phase 2: y = sum_b (z_b*scale_b + shift_b) [+ identity] [ReLU]."""

    def kernel(*refs):
        y = None
        idx = 0
        for _ in range(n_branches):
            z_ref, sc_ref, sh_ref = refs[idx], refs[idx + 1], refs[idx + 2]
            idx += 3
            t = z_ref[...] * sc_ref[...] + sh_ref[...]
            y = t if y is None else y + t
        if add_identity:
            y = y + refs[idx][...]
            idx += 1
        if apply_relu:
            y = jnp.maximum(y, 0.0)
        o_ref = refs[idx]
        o_ref[...] = y.astype(o_ref.dtype)

    return kernel


# ----------------------------------------------------------------------------
# pallas_call wrappers
# ----------------------------------------------------------------------------
def _conv_stats_call(patches_list, weights_list, cp, tm):
    """Each branch: patches (Mp, K_b) bf16, weights (K_b, Cp) bf16.
    Returns [(z_b (Mp, Cp) f32, stats_b (2, Cp) f32), ...]."""
    n = len(patches_list)
    mp = patches_list[0].shape[0]
    grid = (mp // tm,)

    in_specs, args, out_shapes, out_specs = [], [], [], []
    vmem = 0
    for p, w in zip(patches_list, weights_list):
        k = p.shape[1]
        in_specs += [pl.BlockSpec((tm, k), lambda i: (i, 0)),
                     pl.BlockSpec((k, cp), lambda i: (0, 0))]
        args += [p, w]
        out_shapes += [jax.ShapeDtypeStruct((mp, cp), jnp.float32),
                       jax.ShapeDtypeStruct((2, cp), jnp.float32)]
        out_specs += [pl.BlockSpec((tm, cp), lambda i: (i, 0)),
                      pl.BlockSpec((2, cp), lambda i: (0, 0))]
        vmem += 2 * (tm * k * 2 + k * cp * 2 + tm * cp * 4 + 2 * cp * 4)

    outs = pl.pallas_call(
        _make_conv_stats_kernel(n),
        out_shape=tuple(out_shapes),
        grid=grid,
        in_specs=in_specs,
        out_specs=tuple(out_specs),
        compiler_params=pltpu.CompilerParams(
            # stats block is revisited/accumulated across M tiles.
            dimension_semantics=("arbitrary",),
            vmem_limit_bytes=_vmem_limit(vmem)),
    )(*args)
    return [(outs[2 * b], outs[2 * b + 1]) for b in range(n)]


def _apply_call(z_list, scale_list, shift_list, residual, apply_relu, tm):
    mp, cp = z_list[0].shape
    grid = (mp // tm,)

    in_specs, args = [], []
    vmem = 2 * tm * cp * 4  # output double buffer
    for z, s, sh in zip(z_list, scale_list, shift_list):
        in_specs += [pl.BlockSpec((tm, cp), lambda i: (i, 0)),
                     pl.BlockSpec((1, cp), lambda i: (0, 0)),
                     pl.BlockSpec((1, cp), lambda i: (0, 0))]
        args += [z, s, sh]
        vmem += 2 * (tm * cp * 4 + 2 * cp * 4)
    add_identity = residual is not None
    if add_identity:
        in_specs.append(pl.BlockSpec((tm, cp), lambda i: (i, 0)))
        args.append(residual)
        vmem += 2 * tm * cp * 4

    return pl.pallas_call(
        _make_apply_kernel(len(z_list), add_identity, apply_relu),
        out_shape=jax.ShapeDtypeStruct((mp, cp), jnp.float32),
        grid=grid,
        in_specs=in_specs,
        out_specs=pl.BlockSpec((tm, cp), lambda i: (i, 0)),
        compiler_params=pltpu.CompilerParams(
            # tiles are independent -> shard across TensorCores (v7x megacore).
            dimension_semantics=("parallel",),
            vmem_limit_bytes=_vmem_limit(vmem)),
    )(*args)


def _bn_scale_shift(stats, gamma, beta, m, cp):
    """Fold BN (batch stats) into per-channel scale/shift.  Tiny JAX glue."""
    mean = stats[0] / m
    var = jnp.maximum(stats[1] / m - mean * mean, 0.0)
    g = jnp.pad(gamma, (0, cp - gamma.shape[0]))
    b = jnp.pad(beta, (0, cp - beta.shape[0]))
    scale = g * jax.lax.rsqrt(var + EPS)
    shift = b - mean * scale
    return scale.reshape(1, cp), shift.reshape(1, cp)


# ----------------------------------------------------------------------------
# Plain-JAX glue: im2col, weight layout, parameter init
# ----------------------------------------------------------------------------
def _im2col_3x3(x_nhwc, stride):
    """x: (N,H,W,C) -> patches (N*Ho*Wo, 9*C), plus (N,Ho,Wo)."""
    N, H, W, C = x_nhwc.shape
    xp = jnp.pad(x_nhwc, ((0, 0), (1, 1), (1, 1), (0, 0)))
    Ho = (H + 2 - 3) // stride + 1
    Wo = (W + 2 - 3) // stride + 1
    cols = []
    for ky in range(3):
        for kx in range(3):
            cols.append(
                xp[:, ky:ky + stride * (Ho - 1) + 1:stride,
                      kx:kx + stride * (Wo - 1) + 1:stride, :])
    p = jnp.concatenate(cols, axis=-1)            # (N, Ho, Wo, 9*C)
    return p.reshape(N * Ho * Wo, 9 * C), (N, Ho, Wo)


def _w3x3_to_mat(w_oihw):
    """PyTorch (Cout, Cin, 3, 3) -> (9*Cin, Cout) matching im2col ordering."""
    Cout, Cin, _, _ = w_oihw.shape
    return jnp.transpose(w_oihw, (2, 3, 1, 0)).reshape(9 * Cin, Cout)


def init_basic_block_params(key, in_planes, planes, stride):
    ks = jax.random.split(key, 8)
    p = {
        "w1": 0.1 * jax.random.normal(ks[0], (planes, in_planes, 3, 3), jnp.float32),
        "g1": 1.0 + 0.1 * jax.random.normal(ks[1], (planes,), jnp.float32),
        "b1": 0.1 * jax.random.normal(ks[2], (planes,), jnp.float32),
        "w2": 0.1 * jax.random.normal(ks[3], (planes, planes, 3, 3), jnp.float32),
        "g2": 1.0 + 0.1 * jax.random.normal(ks[4], (planes,), jnp.float32),
        "b2": 0.1 * jax.random.normal(ks[5], (planes,), jnp.float32),
    }
    if stride != 1 or in_planes != planes:
        p["w_sc"] = 0.1 * jax.random.normal(ks[6], (planes, in_planes, 1, 1), jnp.float32)
        p["g_sc"] = 1.0 + 0.1 * jax.random.normal(ks[7], (planes,), jnp.float32)
        p["b_sc"] = jnp.full((planes,), 0.05, jnp.float32)
    return p


# ----------------------------------------------------------------------------
# BasicBlock forward (Pallas)
# ----------------------------------------------------------------------------
@functools.partial(jax.jit, static_argnames=("stride", "tm"))
def basic_block_pallas(x_nchw, params, stride, tm=512):
    x = jnp.transpose(x_nchw, (0, 2, 3, 1)).astype(jnp.float32)  # NCHW -> NHWC
    N, H, W, cin = x.shape
    c = params["w1"].shape[0]
    cp = _round_up(c, LANE)                                      # lane-dense Cout

    # ---- conv1 (3x3, stride, pad=1): stats pass + apply pass (BN + ReLU) ----
    p1, (N, ho, wo) = _im2col_3x3(x, stride)
    m = N * ho * wo
    tm_eff = min(_round_up(tm, 8), _round_up(m, 8))
    mp = _round_up(m, tm_eff)                                    # pad rows to tile grid

    p1 = _pad2d(p1, mp, None).astype(jnp.bfloat16)
    w1 = _pad2d(_w3x3_to_mat(params["w1"]), None, cp).astype(jnp.bfloat16)
    (z1, st1), = _conv_stats_call([p1], [w1], cp, tm_eff)
    s1, sh1 = _bn_scale_shift(st1, params["g1"], params["b1"], m, cp)
    h = _apply_call([z1], [s1], [sh1], None, True, tm_eff)       # (mp, cp) f32

    # ---- conv2 patches from the valid part of h ----
    h_img = h[:m, :c].reshape(N, ho, wo, c)
    p2, _ = _im2col_3x3(h_img, 1)
    p2 = _pad2d(p2, mp, None).astype(jnp.bfloat16)
    w2 = _pad2d(_w3x3_to_mat(params["w2"]), None, cp).astype(jnp.bfloat16)

    if "w_sc" in params:
        # Projection shortcut (1x1 conv + BN) fused into the conv2 passes:
        # second matmul branch on the same M tiling + fused normalize/add/ReLU.
        xs = x[:, ::stride, ::stride, :].reshape(m, cin)
        xs = _pad2d(xs, mp, None).astype(jnp.bfloat16)
        w_sc = _pad2d(params["w_sc"].reshape(c, cin).T, None, cp).astype(jnp.bfloat16)

        (z2, st2), (zsc, stsc) = _conv_stats_call([p2, xs], [w2, w_sc], cp, tm_eff)
        s2, sh2 = _bn_scale_shift(st2, params["g2"], params["b2"], m, cp)
        ssc, shsc = _bn_scale_shift(stsc, params["g_sc"], params["b_sc"], m, cp)
        out = _apply_call([z2, zsc], [s2, ssc], [sh2, shsc], None, True, tm_eff)
    else:
        # Identity shortcut (cin == c): residual added in the apply pass.
        res = _pad2d(x.reshape(m, cin), mp, cp)                  # f32 epilogue
        (z2, st2), = _conv_stats_call([p2], [w2], cp, tm_eff)
        s2, sh2 = _bn_scale_shift(st2, params["g2"], params["b2"], m, cp)
        out = _apply_call([z2], [s2], [sh2], res, True, tm_eff)

    out = out[:m, :c].reshape(N, ho, wo, c)
    return jnp.transpose(out, (0, 3, 1, 2))                      # NHWC -> NCHW


# ----------------------------------------------------------------------------
# Pure-JAX reference (lax.conv, f32) for correctness
# ----------------------------------------------------------------------------
def _conv_ref(x_nhwc, w_oihw, stride, pad):
    w = jnp.transpose(w_oihw, (2, 3, 1, 0))              # HWIO
    return jax.lax.conv_general_dilated(
        x_nhwc, w, (stride, stride), [(pad, pad), (pad, pad)],
        dimension_numbers=("NHWC", "HWIO", "NHWC"))


def _bn_ref(z, g, b):
    mean = jnp.mean(z, axis=(0, 1, 2))
    var = jnp.var(z, axis=(0, 1, 2))                     # biased, like PyTorch train
    return (z - mean) * jax.lax.rsqrt(var + EPS) * g + b


def basic_block_ref(x_nchw, params, stride):
    x = jnp.transpose(x_nchw, (0, 2, 3, 1)).astype(jnp.float32)
    h = jnp.maximum(_bn_ref(_conv_ref(x, params["w1"], stride, 1),
                            params["g1"], params["b1"]), 0.0)
    y = _bn_ref(_conv_ref(h, params["w2"], 1, 1), params["g2"], params["b2"])
    if "w_sc" in params:
        sc = _bn_ref(_conv_ref(x, params["w_sc"], stride, 0),
                     params["g_sc"], params["b_sc"])
    else:
        sc = x
    out = jnp.maximum(y + sc, 0.0)
    return jnp.transpose(out, (0, 3, 1, 2))              # NCHW


# ----------------------------------------------------------------------------
if __name__ == "__main__":
    key = jax.random.PRNGKey(0)
    kx, kp1, kp2 = jax.random.split(key, 3)

    # Case 1: stride=2, in_planes != planes -> projection shortcut (fused).
    x1 = jax.random.normal(kx, (2, 4, 16, 16), jnp.float32)        # NCHW
    params1 = init_basic_block_params(kp1, in_planes=4, planes=8, stride=2)
    out1 = basic_block_pallas(x1, params1, 2, tm=128)
    jax.block_until_ready(out1)
    ref1 = basic_block_ref(x1, params1, 2)
    assert out1.shape == (2, 8, 8, 8)
    # bf16 matmul operands vs f32 reference -> looser tolerance.
    assert float(jnp.max(jnp.abs(out1 - ref1))) < 5e-2

    # Case 2: stride=1, in_planes == planes -> identity shortcut, 4 M-tiles.
    x2 = jax.random.normal(kx, (2, 8, 16, 16), jnp.float32)        # NCHW
    params2 = init_basic_block_params(kp2, in_planes=8, planes=8, stride=1)
    out2 = basic_block_pallas(x2, params2, 1, tm=128)
    jax.block_until_ready(out2)
    ref2 = basic_block_ref(x2, params2, 1)
    assert out2.shape == (2, 8, 16, 16)
    assert float(jnp.max(jnp.abs(out2 - ref2))) < 5e-2

    print("KERNEL_OK")
</pallas_src>

<mosaic_0001>
module attributes {stable_mosaic.version = 11 : i64} {
  func.func @kernel(%arg0: i32, %arg1: memref<128x36xbf16, #tpu.memory_space<vmem>>, %arg2: memref<36x128xbf16, #tpu.memory_space<vmem>>, %arg3: memref<128x128xf32, #tpu.memory_space<vmem>>, %arg4: memref<2x128xf32, #tpu.memory_space<vmem>>) attributes {dimension_semantics = [#tpu.dimension_semantics<arbitrary>], iteration_bounds = array<i64: 1>, scalar_prefetch = 0 : i64, scratch_operands = 0 : i64, tpu.core_type = #tpu.core_type<tc>, window_params = [{transform_indices = @transform_0, window_bounds = array<i64: 128, 36>}, {pipeline_mode = #tpu.pipeline_mode<synchronous>, transform_indices = @transform_1, window_bounds = array<i64: 36, 128>}, {transform_indices = @transform_2, window_bounds = array<i64: 128, 128>}, {pipeline_mode = #tpu.pipeline_mode<synchronous>, transform_indices = @transform_3, window_bounds = array<i64: 2, 128>}]} {
    %c0_i32 = arith.constant 0 : i32
    %0 = arith.cmpi eq, %arg0, %c0_i32 : i32
    %c0 = arith.constant 0 : index
    %c0_0 = arith.constant 0 : index
    %1 = vector.load %arg1[%c0, %c0_0] : memref<128x36xbf16, #tpu.memory_space<vmem>>, vector<128x36xbf16>
    %c0_1 = arith.constant 0 : index
    %c0_2 = arith.constant 0 : index
    %2 = vector.load %arg2[%c0_1, %c0_2] : memref<36x128xbf16, #tpu.memory_space<vmem>>, vector<36x128xbf16>
    %cst = arith.constant dense<0.000000e+00> : vector<128x128xf32>
    %3 = tpu.matmul %1, %2, %cst {dimension_numbers = #tpu.dot_dimension_numbers<[1], [0], [0], [1], [0, 0, 1, 1], [], []>} : vector<128x36xbf16>, vector<36x128xbf16>, vector<128x128xf32> -> vector<128x128xf32>
    %c0_3 = arith.constant 0 : index
    %c0_4 = arith.constant 0 : index
    %4 = vector.load %arg3[%c0_3, %c0_4] : memref<128x128xf32, #tpu.memory_space<vmem>>, vector<128x128xf32>
    tpu.vector_store %arg3[%c0_3, %c0_4], %3 {strides = array<i32>} : memref<128x128xf32, #tpu.memory_space<vmem>>, vector<128x128xf32>,
    %cst_5 = arith.constant dense<0.000000e+00> : vector<128xf32>
    %5 = vector.multi_reduction <add>, %3, %cst_5 [0] : vector<128x128xf32> to vector<128xf32>
    %6 = vector.shape_cast %5 : vector<128xf32> to vector<1x128xf32>
    %7 = arith.mulf %3, %3 : vector<128x128xf32>
    %cst_6 = arith.constant dense<0.000000e+00> : vector<128xf32>
    %8 = vector.multi_reduction <add>, %7, %cst_6 [0] : vector<128x128xf32> to vector<128xf32>
    %9 = vector.shape_cast %8 : vector<128xf32> to vector<1x128xf32>
    %10 = tpu.concatenate %6, %9 in 0 : vector<1x128xf32>, vector<1x128xf32> -> vector<2x128xf32>
    %11 = arith.extui %0 : i1 to i32
    %c0_i32_7 = arith.constant 0 : i32
    %12 = arith.cmpi ne, %11, %c0_i32_7 : i32
    scf.if %12 {
      %cst_12 = arith.constant 0.000000e+00 : f32
      %16 = vector.broadcast %cst_12 : f32 to vector<2x128xf32>
      %c0_13 = arith.constant 0 : index
      %c0_14 = arith.constant 0 : index
      %17 = vector.load %arg4[%c0_13, %c0_14] : memref<2x128xf32, #tpu.memory_space<vmem>>, vector<2x128xf32>
      tpu.vector_store %arg4[%c0_13, %c0_14], %16 {strides = array<i32>} : memref<2x128xf32, #tpu.memory_space<vmem>>, vector<2x128xf32>,
    } else {
    }
    %c0_8 = arith.constant 0 : index
    %c0_9 = arith.constant 0 : index
    %13 = vector.load %arg4[%c0_8, %c0_9] : memref<2x128xf32, #tpu.memory_space<vmem>>, vector<2x128xf32>
    %14 = arith.addf %13, %10 : vector<2x128xf32>
    %c0_10 = arith.constant 0 : index
    %c0_11 = arith.constant 0 : index
    %15 = vector.load %arg4[%c0_10, %c0_11] : memref<2x128xf32, #tpu.memory_space<vmem>>, vector<2x128xf32>
    tpu.vector_store %arg4[%c0_10, %c0_11], %14 {strides = array<i32>} : memref<2x128xf32, #tpu.memory_space<vmem>>, vector<2x128xf32>,
    return
  }
  func.func @transform_0(%arg0: i32) -> (i32, i32) {
    %c0_i32 = arith.constant 0 : i32
    %c0_i32_0 = arith.constant 0 : i32
    return %arg0, %c0_i32 : i32, i32
  }
  func.func @transform_1(%arg0: i32) -> (i32, i32) {
    %c0_i32 = arith.constant 0 : i32
    %c0_i32_0 = arith.constant 0 : i32
    %c0_i32_1 = arith.constant 0 : i32
    return %c0_i32, %c0_i32_0 : i32, i32
  }
  func.func @transform_2(%arg0: i32) -> (i32, i32) {
    %c0_i32 = arith.constant 0 : i32
    %c0_i32_0 = arith.constant 0 : i32
    return %arg0, %c0_i32 : i32, i32
  }
  func.func @transform_3(%arg0: i32) -> (i32, i32) {
    %c0_i32 = arith.constant 0 : i32
    %c0_i32_0 = arith.constant 0 : i32
    %c0_i32_1 = arith.constant 0 : i32
    return %c0_i32, %c0_i32_0 : i32, i32
  }
}

module attributes {stable_mosaic.version = 11 : i64} {
  func.func @kernel(%arg0: i32, %arg1: memref<128x128xf32, #tpu.memory_space<vmem>>, %arg2: memref<1x128xf32, #tpu.memory_space<vmem>>, %arg3: memref<1x128xf32, #tpu.memory_space<vmem>>, %arg4: memref<128x128xf32, #tpu.memory_space<vmem>>) attributes {dimension_semantics = [#tpu.dimension_semantics<parallel>], iteration_bounds = array<i64: 1>, scalar_prefetch = 0 : i64, scratch_operands = 0 : i64, tpu.core_type = #tpu.core_type<tc>, window_params = [{transform_indices = @transform_0, window_bounds = array<i64: 128, 128>}, {pipeline_mode = #tpu.pipeline_mode<synchronous>, transform_indices = @transform_1, window_bounds = array<i64: 1, 128>}, {pipeline_mode = #tpu.pipeline_mode<synchronous>, transform_indices = @transform_2, window_bounds = array<i64: 1, 128>}, {transform_indices = @transform_3, window_bounds = array<i64: 128, 128>}]} {
    %c0 = arith.constant 0 : index
    %c0_0 = arith.constant 0 : index
    %0 = vector.load %arg1[%c0, %c0_0] : memref<128x128xf32, #tpu.memory_space<vmem>>, vector<128x128xf32>
    %c0_1 = arith.constant 0 : index
    %c0_2 = arith.constant 0 : index
    %1 = vector.load %arg2[%c0_1, %c0_2] : memref<1x128xf32, #tpu.memory_space<vmem>>, vector<1x128xf32>
    %2 = vector.broadcast %1 : vector<1x128xf32> to vector<128x128xf32>
    %3 = arith.mulf %0, %2 : vector<128x128xf32>
    %c0_3 = arith.constant 0 : index
    %c0_4 = arith.constant 0 : index
    %4 = vector.load %arg3[%c0_3, %c0_4] : memref<1x128xf32, #tpu.memory_space<vmem>>, vector<1x128xf32>
    %5 = vector.broadcast %4 : vector<1x128xf32> to vector<128x128xf32>
    %6 = arith.addf %3, %5 : vector<128x128xf32>
    %cst = arith.constant 0.000000e+00 : f32
    %7 = vector.broadcast %cst : f32 to vector<128x128xf32>
    %8 = arith.maximumf %6, %7 : vector<128x128xf32>
    %c0_5 = arith.constant 0 : index
    %c0_6 = arith.constant 0 : index
    %9 = vector.load %arg4[%c0_5, %c0_6] : memref<128x128xf32, #tpu.memory_space<vmem>>, vector<128x128xf32>
    tpu.vector_store %arg4[%c0_5, %c0_6], %8 {strides = array<i32>} : memref<128x128xf32, #tpu.memory_space<vmem>>, vector<128x128xf32>,
    return
  }
  func.func @transform_0(%arg0: i32) -> (i32, i32) {
    %c0_i32 = arith.constant 0 : i32
    %c0_i32_0 = arith.constant 0 : i32
    return %arg0, %c0_i32 : i32, i32
  }
  func.func @transform_1(%arg0: i32) -> (i32, i32) {
    %c0_i32 = arith.constant 0 : i32
    %c0_i32_0 = arith.constant 0 : i32
    %c0_i32_1 = arith.constant 0 : i32
    return %c0_i32, %c0_i32_0 : i32, i32
  }
  func.func @transform_2(%arg0: i32) -> (i32, i32) {
    %c0_i32 = arith.constant 0 : i32
    %c0_i32_0 = arith.constant 0 : i32
    %c0_i32_1 = arith.constant 0 : i32
    return %c0_i32, %c0_i32_0 : i32, i32
  }
  func.func @transform_3(%arg0: i32) -> (i32, i32) {
    %c0_i32 = arith.constant 0 : i32
    %c0_i32_0 = arith.constant 0 : i32
    return %arg0, %c0_i32 : i32, i32
  }
}

module attributes {stable_mosaic.version = 11 : i64} {
  func.func @kernel(%arg0: i32, %arg1: memref<128x72xbf16, #tpu.memory_space<vmem>>, %arg2: memref<72x128xbf16, #tpu.memory_space<vmem>>, %arg3: memref<128x4xbf16, #tpu.memory_space<vmem>>, %arg4: memref<4x128xbf16, #tpu.memory_space<vmem>>, %arg5: memref<128x128xf32, #tpu.memory_space<vmem>>, %arg6: memref<2x128xf32, #tpu.memory_space<vmem>>, %arg7: memref<128x128xf32, #tpu.memory_space<vmem>>, %arg8: memref<2x128xf32, #tpu.memory_space<vmem>>) attributes {dimension_semantics = [#tpu.dimension_semantics<arbitrary>], iteration_bounds = array<i64: 1>, scalar_prefetch = 0 : i64, scratch_operands = 0 : i64, tpu.core_type = #tpu.core_type<tc>, window_params = [{transform_indices = @transform_0, window_bounds = array<i64: 128, 72>}, {pipeline_mode = #tpu.pipeline_mode<synchronous>, transform_indices = @transform_1, window_bounds = array<i64: 72, 128>}, {transform_indices = @transform_2, window_bounds = array<i64: 128, 4>}, {pipeline_mode = #tpu.pipeline_mode<synchronous>, transform_indices = @transform_3, window_bounds = array<i64: 4, 128>}, {transform_indices = @transform_4, window_bounds = array<i64: 128, 128>}, {pipeline_mode = #tpu.pipeline_mode<synchronous>, transform_indices = @transform_5, window_bounds = array<i64: 2, 128>}, {transform_indices = @transform_6, window_bounds = array<i64: 128, 128>}, {pipeline_mode = #tpu.pipeline_mode<synchronous>, transform_indices = @transform_7, window_bounds = array<i64: 2, 128>}]} {
    %c0_i32 = arith.constant 0 : i32
    %0 = arith.cmpi eq, %arg0, %c0_i32 : i32
    %c0 = arith.constant 0 : index
    %c0_0 = arith.constant 0 : index
    %1 = vector.load %arg1[%c0, %c0_0] : memref<128x72xbf16, #tpu.memory_space<vmem>>, vector<128x72xbf16>
    %c0_1 = arith.constant 0 : index
    %c0_2 = arith.constant 0 : index
    %2 = vector.load %arg2[%c0_1, %c0_2] : memref<72x128xbf16, #tpu.memory_space<vmem>>, vector<72x128xbf16>
    %cst = arith.constant dense<0.000000e+00> : vector<128x128xf32>
    %3 = tpu.matmul %1, %2, %cst {dimension_numbers = #tpu.dot_dimension_numbers<[1], [0], [0], [1], [0, 0, 1, 1], [], []>} : vector<128x72xbf16>, vector<72x128xbf16>, vector<128x128xf32> -> vector<128x128xf32>
    %c0_3 = arith.constant 0 : index
    %c0_4 = arith.constant 0 : index
    %4 = vector.load %arg5[%c0_3, %c0_4] : memref<128x128xf32, #tpu.memory_space<vmem>>, vector<128x128xf32>
    tpu.vector_store %arg5[%c0_3, %c0_4], %3 {strides = array<i32>} : memref<128x128xf32, #tpu.memory_space<vmem>>, vector<128x128xf32>,
    %cst_5 = arith.constant dense<0.000000e+00> : vector<128xf32>
    %5 = vector.multi_reduction <add>, %3, %cst_5 [0] : vector<128x128xf32> to vector<128xf32>
    %6 = vector.shape_cast %5 : vector<128xf32> to vector<1x128xf32>
    %7 = arith.mulf %3, %3 : vector<128x128xf32>
    %cst_6 = arith.constant dense<0.000000e+00> : vector<128xf32>
    %8 = vector.multi_reduction <add>, %7, %cst_6 [0] : vector<128x128xf32> to vector<128xf32>
    %9 = vector.shape_cast %8 : vector<128xf32> to vector<1x128xf32>
    %10 = tpu.concatenate %6, %9 in 0 : vector<1x128xf32>, vector<1x128xf32> -> vector<2x128xf32>
    %11 = arith.extui %0 : i1 to i32
    %c0_i32_7 = arith.constant 0 : i32
    %12 = arith.cmpi ne, %11, %c0_i32_7 : i32
    scf.if %12 {
      %cst_26 = arith.constant 0.000000e+00 : f32
      %31 = vector.broadcast %cst_26 : f32 to vector<2x128xf32>
      %c0_27 = arith.constant 0 : index
      %c0_28 = arith.constant 0 : index
      %32 = vector.load %arg6[%c0_27, %c0_28] : memref<2x128xf32, #tpu.memory_space<vmem>>, vector<2x128xf32>
      tpu.vector_store %arg6[%c0_27, %c0_28], %31 {strides = array<i32>} : memref<2x128xf32, #tpu.memory_space<vmem>>, vector<2x128xf32>,
    } else {
    }
    %c0_8 = arith.constant 0 : index
    %c0_9 = arith.constant 0 : index
    %13 = vector.load %arg6[%c0_8, %c0_9] : memref<2x128xf32, #tpu.memory_space<vmem>>, vector<2x128xf32>
    %14 = arith.addf %13, %10 : vector<2x128xf32>
    %c0_10 = arith.constant 0 : index
    %c0_11 = arith.constant 0 : index
    %15 = vector.load %arg6[%c0_10, %c0_11] : memref<2x128xf32, #tpu.memory_space<vmem>>, vector<2x128xf32>
    tpu.vector_store %arg6[%c0_10, %c0_11], %14 {strides = array<i32>} : memref<2x128xf32, #tpu.memory_space<vmem>>, vector<2x128xf32>,
    %c0_12 = arith.constant 0 : index
    %c0_13 = arith.constant 0 : index
    %16 = vector.load %arg3[%c0_12, %c0_13] : memref<128x4xbf16, #tpu.memory_space<vmem>>, vector<128x4xbf16>
    %c0_14 = arith.constant 0 : index
    %c0_15 = arith.constant 0 : index
    %17 = vector.load %arg4[%c0_14, %c0_15] : memref<4x128xbf16, #tpu.memory_space<vmem>>, vector<4x128xbf16>
    %cst_16 = arith.constant dense<0.000000e+00> : vector<128x128xf32>
    %18 = tpu.matmul %16, %17, %cst_16 {dimension_numbers = #tpu.dot_dimension_numbers<[1], [0], [0], [1], [0, 0, 1, 1], [], []>} : vector<128x4xbf16>, vector<4x128xbf16>, vector<128x128xf32> -> vector<128x128xf32>
    %c0_17 = arith.constant 0 : index
    %c0_18 = arith.constant 0 : index
    %19 = vector.load %arg7[%c0_17, %c0_18] : memref<128x128xf32, #tpu.memory_space<vmem>>, vector<128x128xf32>
    tpu.vector_store %arg7[%c0_17, %c0_18], %18 {strides = array<i32>} : memref<128x128xf32, #tpu.memory_space<vmem>>, vector<128x128xf32>,
    %cst_19 = arith.constant dense<0.000000e+00> : vector<128xf32>
    %20 = vector.multi_reduction <add>, %18, %cst_19 [0] : vector<128x128xf32> to vector<128xf32>
    %21 = vector.shape_cast %20 : vector<128xf32> to vector<1x128xf32>
    %22 = arith.mulf %18, %18 : vector<128x128xf32>
    %cst_20 = arith.constant dense<0.000000e+00> : vector<128xf32>
    %23 = vector.multi_reduction <add>, %22, %cst_20 [0] : vector<128x128xf32> to vector<128xf32>
    %24 = vector.shape_cast %23 : vector<128xf32> to vector<1x128xf32>
    %25 = tpu.concatenate %21, %24 in 0 : vector<1x128xf32>, vector<1x128xf32> -> vector<2x128xf32>
    %26 = arith.extui %0 : i1 to i32
    %c0_i32_21 = arith.constant 0 : i32
    %27 = arith.cmpi ne, %26, %c0_i32_21 : i32
    scf.if %27 {
      %cst_26 = arith.constant 0.000000e+00 : f32
      %31 = vector.broadcast %cst_26 : f32 to vector<2x128xf32>
      %c0_27 = arith.constant 0 : index
      %c0_28 = arith.constant 0 : index
      %32 = vector.load %arg8[%c0_27, %c0_28] : memref<2x128xf32, #tpu.memory_space<vmem>>, vector<2x128xf32>
      tpu.vector_store %arg8[%c0_27, %c0_28], %31 {strides = array<i32>} : memref<2x128xf32, #tpu.memory_space<vmem>>, vector<2x128xf32>,
    } else {
    }
    %c0_22 = arith.constant 0 : index
    %c0_23 = arith.constant 0 : index
    %28 = vector.load %arg8[%c0_22, %c0_23] : memref<2x128xf32, #tpu.memory_space<vmem>>, vector<2x128xf32>
    %29 = arith.addf %28, %25 : vector<2x128xf32>
    %c0_24 = arith.constant 0 : index
    %c0_25 = arith.constant 0 : index
    %30 = vector.load %arg8[%c0_24, %c0_25] : memref<2x128xf32, #tpu.memory_space<vmem>>, vector<2x128xf32>
    tpu.vector_store %arg8[%c0_24, %c0_25], %29 {strides = array<i32>} : memref<2x128xf32, #tpu.memory_space<vmem>>, vector<2x128xf32>,
    return
  }
  func.func @transform_0(%arg0: i32) -> (i32, i32) {
    %c0_i32 = arith.constant 0 : i32
    %c0_i32_0 = arith.constant 0 : i32
    return %arg0, %c0_i32 : i32, i32
  }
  func.func @transform_1(%arg0: i32) -> (i32, i32) {
    %c0_i32 = arith.constant 0 : i32
    %c0_i32_0 = arith.constant 0 : i32
    %c0_i32_1 = arith.constant 0 : i32
    return %c0_i32, %c0_i32_0 : i32, i32
  }
  func.func @transform_2(%arg0: i32) -> (i32, i32) {
    %c0_i32 = arith.constant 0 : i32
    %c0_i32_0 = arith.constant 0 : i32
    return %arg0, %c0_i32 : i32, i32
  }
  func.func @transform_3(%arg0: i32) -> (i32, i32) {
    %c0_i32 = arith.constant 0 : i32
    %c0_i32_0 = arith.constant 0 : i32
    %c0_i32_1 = arith.constant 0 : i32
    return %c0_i32, %c0_i32_0 : i32, i32
  }
  func.func @transform_4(%arg0: i32) -> (i32, i32) {
    %c0_i32 = arith.constant 0 : i32
    %c0_i32_0 = arith.constant 0 : i32
    return %arg0, %c0_i32 : i32, i32
  }
  func.func @transform_5(%arg0: i32) -> (i32, i32) {
    %c0_i32 = arith.constant 0 : i32
    %c0_i32_0 = arith.constant 0 : i32
    %c0_i32_1 = arith.constant 0 : i32
    return %c0_i32, %c0_i32_0 : i32, i32
  }
  func.func @transform_6(%arg0: i32) -> (i32, i32) {
    %c0_i32 = arith.constant 0 : i32
    %c0_i32_0 = arith.constant 0 : i32
    return %arg0, %c0_i32 : i32, i32
  }
  func.func @transform_7(%arg0: i32) -> (i32, i32) {
    %c0_i32 = arith.constant 0 : i32
    %c0_i32_0 = arith.constant 0 : i32
    %c0_i32_1 = arith.constant 0 : i32
    return %c0_i32, %c0_i32_0 : i32, i32
  }
}

module attributes {stable_mosaic.version = 11 : i64} {
  func.func @kernel(%arg0: i32, %arg1: memref<128x128xf32, #tpu.memory_space<vmem>>, %arg2: memref<1x128xf32, #tpu.memory_space<vmem>>, %arg3: memref<1x128xf32, #tpu.memory_space<vmem>>, %arg4: memref<128x128xf32, #tpu.memory_space<vmem>>, %arg5: memref<1x128xf32, #tpu.memory_space<vmem>>, %arg6: memref<1x128xf32, #tpu.memory_space<vmem>>, %arg7: memref<128x128xf32, #tpu.memory_space<vmem>>) attributes {dimension_semantics = [#tpu.dimension_semantics<parallel>], iteration_bounds = array<i64: 1>, scalar_prefetch = 0 : i64, scratch_operands = 0 : i64, tpu.core_type = #tpu.core_type<tc>, window_params = [{transform_indices = @transform_0, window_bounds = array<i64: 128, 128>}, {pipeline_mode = #tpu.pipeline_mode<synchronous>, transform_indices = @transform_1, window_bounds = array<i64: 1, 128>}, {pipeline_mode = #tpu.pipeline_mode<synchronous>, transform_indices = @transform_2, window_bounds = array<i64: 1, 128>}, {transform_indices = @transform_3, window_bounds = array<i64: 128, 128>}, {pipeline_mode = #tpu.pipeline_mode<synchronous>, transform_indices = @transform_4, window_bounds = array<i64: 1, 128>}, {pipeline_mode = #tpu.pipeline_mode<synchronous>, transform_indices = @transform_5, window_bounds = array<i64: 1, 128>}, {transform_indices = @transform_6, window_bounds = array<i64: 128, 128>}]} {
    %c0 = arith.constant 0 : index
    %c0_0 = arith.constant 0 : index
    %0 = vector.load %arg1[%c0, %c0_0] : memref<128x128xf32, #tpu.memory_space<vmem>>, vector<128x128xf32>
    %c0_1 = arith.constant 0 : index
    %c0_2 = arith.constant 0 : index
    %1 = vector.load %arg2[%c0_1, %c0_2] : memref<1x128xf32, #tpu.memory_space<vmem>>, vector<1x128xf32>
    %2 = vector.broadcast %1 : vector<1x128xf32> to vector<128x128xf32>
    %3 = arith.mulf %0, %2 : vector<128x128xf32>
    %c0_3 = arith.constant 0 : index
    %c0_4 = arith.constant 0 : index
    %4 = vector.load %arg3[%c0_3, %c0_4] : memref<1x128xf32, #tpu.memory_space<vmem>>, vector<1x128xf32>
    %5 = vector.broadcast %4 : vector<1x128xf32> to vector<128x128xf32>
    %6 = arith.addf %3, %5 : vector<128x128xf32>
    %c0_5 = arith.constant 0 : index
    %c0_6 = arith.constant 0 : index
    %7 = vector.load %arg4[%c0_5, %c0_6] : memref<128x128xf32, #tpu.memory_space<vmem>>, vector<128x128xf32>
    %c0_7 = arith.constant 0 : index
    %c0_8 = arith.constant 0 : index
    %8 = vector.load %arg5[%c0_7, %c0_8] : memref<1x128xf32, #tpu.memory_space<vmem>>, vector<1x128xf32>
    %9 = vector.broadcast %8 : vector<1x128xf32> to vector<128x128xf32>
    %10 = arith.mulf %7, %9 : vector<128x128xf32>
    %c0_9 = arith.constant 0 : index
    %c0_10 = arith.constant 0 : index
    %11 = vector.load %arg6[%c0_9, %c0_10] : memref<1x128xf32, #tpu.memory_space<vmem>>, vector<1x128xf32>
    %12 = vector.broadcast %11 : vector<1x128xf32> to vector<128x128xf32>
    %13 = arith.addf %10, %12 : vector<128x128xf32>
    %14 = arith.addf %6, %13 : vector<128x128xf32>
    %cst = arith.constant 0.000000e+00 : f32
    %15 = vector.broadcast %cst : f32 to vector<128x128xf32>
    %16 = arith.maximumf %14, %15 : vector<128x128xf32>
    %c0_11 = arith.constant 0 : index
    %c0_12 = arith.constant 0 : index
    %17 = vector.load %arg7[%c0_11, %c0_12] : memref<128x128xf32, #tpu.memory_space<vmem>>, vector<128x128xf32>
    tpu.vector_store %arg7[%c0_11, %c0_12], %16 {strides = array<i32>} : memref<128x128xf32, #tpu.memory_space<vmem>>, vector<128x128xf32>,
    return
  }
  func.func @transform_0(%arg0: i32) -> (i32, i32) {
    %c0_i32 = arith.constant 0 : i32
    %c0_i32_0 = arith.constant 0 : i32
    return %arg0, %c0_i32 : i32, i32
  }
  func.func @transform_1(%arg0: i32) -> (i32, i32) {
    %c0_i32 = arith.constant 0 : i32
    %c0_i32_0 = arith.constant 0 : i32
    %c0_i32_1 = arith.constant 0 : i32
    return %c0_i32, %c0_i32_0 : i32, i32
  }
  func.func @transform_2(%arg0: i32) -> (i32, i32) {
    %c0_i32 = arith.constant 0 : i32
    %c0_i32_0 = arith.constant 0 : i32
    %c0_i32_1 = arith.constant 0 : i32
    return %c0_i32, %c0_i32_0 : i32, i32
  }
  func.func @transform_3(%arg0: i32) -> (i32, i32) {
    %c0_i32 = arith.constant 0 : i32
    %c0_i32_0 = arith.constant 0 : i32
    return %arg0, %c0_i32 : i32, i32
  }
  func.func @transform_4(%arg0: i32) -> (i32, i32) {
    %c0_i32 = arith.constant 0 : i32
    %c0_i32_0 = arith.constant 0 : i32
    %c0_i32_1 = arith.constant 0 : i32
    return %c0_i32, %c0_i32_0 : i32, i32
  }
  func.func @transform_5(%arg0: i32) -> (i32, i32) {
    %c0_i32 = arith.constant 0 : i32
    %c0_i32_0 = arith.constant 0 : i32
    %c0_i32_1 = arith.constant 0 : i32
    return %c0_i32, %c0_i32_0 : i32, i32
  }
  func.func @transform_6(%arg0: i32) -> (i32, i32) {
    %c0_i32 = arith.constant 0 : i32
    %c0_i32_0 = arith.constant 0 : i32
    return %arg0, %c0_i32 : i32, i32
  }
}

</mosaic_0001>

<bundles_post_ra>
// kernel: basic_block_pallas.5
= control target key start
LH: loop header
LB: loop body
LE: loop exit
PB: predicated region body
PF: predicated region fallthrough
CT: control target
= control target key end

     0   :  { %s254_s0 = inlined_call_operand.vmem [shape: f32[128,128], index: 0, kind: input, shape index: {}]   ;;  %s255_s1 = inlined_call_operand.vmem [shape: f32[1,128], index: 1, kind: input, shape index: {}]   ;;  %s256_s2 = inlined_call_operand.vmem [shape: f32[1,128], index: 2, kind: input, shape index: {}]   ;;  %s257_s3 = inlined_call_operand.vmem [shape: f32[128,128], index: 3, kind: output, shape index: {}]  }
   0x1   :  { %v14_v0 = vld [vmem:[%s254_s0] sm:$0xff]  ;;  %v15_v4 = vld [vmem:[%s254_s0 + $0x8] sm:$0xff]  ;;  %v16_v5 = vld [vmem:[%s254_s0 + $0x10] sm:$0xff] }
   0x2   :  { %v112_v1 = vld [vmem:[%s255_s1] ss:$0 sm:$0xff]  ;;  %v17_v6 = vld [vmem:[%s254_s0 + $0x18] sm:$0xff]  ;;  %v19_v11 = vld [vmem:[%s254_s0 + $0x28] sm:$0xff] }
   0x3   :  { %v143_v2 = vld [vmem:[%s256_s2] ss:$0 sm:$0xff]  ;;  %v37_v3 = vmul.f32 %v112_v1, %v14_v0  ;;  %v38_v7 = vmul.f32 %v112_v1, %v15_v4  ;;  %v39_v8 = vmul.f32 %v112_v1, %v16_v5  ;;  %v40_v9 = vmul.f32 %v112_v1, %v17_v6  ;;  %v20_v12 = vld [vmem:[%s254_s0 + $0x30] sm:$0xff]  ;;  %v21_v17 = vld [vmem:[%s254_s0 + $0x38] sm:$0xff] }
   0x4   :  { %v18_v10 = vld [vmem:[%s254_s0 + $0x20] sm:$0xff]  ;;  %v42_v15 = vmul.f32 %v112_v1, %v19_v11  ;;  %v43_v16 = vmul.f32 %v112_v1, %v20_v12  ;;  %v44_v21 = vmul.f32 %v112_v1, %v21_v17  ;;  %v23_v27 = vld [vmem:[%s254_s0 + $0x48] sm:$0xff]  ;;  %v24_v28 = vld [vmem:[%s254_s0 + $0x50] sm:$0xff] }
   0x5   :  { %v60_v13 = vadd.f32 %v143_v2, %v37_v3  ;;  %v41_v14 = vmul.f32 %v112_v1, %v18_v10  ;;  %v61_v18 = vadd.f32 %v143_v2, %v38_v7  ;;  %v62_v19 = vadd.f32 %v143_v2, %v39_v8  ;;  %v22_v22 = vld [vmem:[%s254_s0 + $0x40] sm:$0xff]  ;;  %v25_v29 = vld [vmem:[%s254_s0 + $0x58] sm:$0xff]  ;;  %v27_v35 = vld [vmem:[%s254_s0 + $0x68] sm:$0xff] }
   0x6   :  { %v63_v20 = vadd.f32 %v143_v2, %v40_v9  ;;  %v65_v25 = vadd.f32 %v143_v2, %v42_v15  ;;  %v66_v26 = vadd.f32 %v143_v2, %v43_v16  ;;  %v67_v33 = vadd.f32 %v143_v2, %v44_v21  ;;  %v26_v34 = vld [vmem:[%s254_s0 + $0x60] sm:$0xff]  ;;  %v28_v36 = vld [vmem:[%s254_s0 + $0x70] sm:$0xff]  ;;  %v29_v41 = vld [vmem:[%s254_s0 + $0x78] sm:$0xff] }
   0x7   :  { %v76_v23 = vmax.f32 %v60_v13, 0.0  ;;  %v64_v24 = vadd.f32 %v143_v2, %v41_v14  ;;  %v77_v30 = vmax.f32 %v61_v18, 0.0  ;;  %v78_v31 = vmax.f32 %v62_v19, 0.0 }
   0x8   :  { %v79_v32 = vmax.f32 %v63_v20, 0.0  ;;  %v81_v38 = vmax.f32 %v65_v25, 0.0  ;;  %v82_v39 = vmax.f32 %v66_v26, 0.0  ;;  %v45_v40 = vmul.f32 %v112_v1, %v22_v22 }
   0x9   :  { %92 = vst [vmem:[%s257_s3] sm:$0xff] %v76_v23  ;;  %v80_v37 = vmax.f32 %v64_v24, 0.0  ;;  %93 = vst [vmem:[%s257_s3 + $0x8] sm:$0xff] %v77_v30  ;;  %v83_v42 = vmax.f32 %v67_v33, 0.0  ;;  %v46_v43 = vmul.f32 %v112_v1, %v23_v27  ;;  %v47_v44 = vmul.f32 %v112_v1, %v24_v28 }
   0xa   :  { %94 = vst [vmem:[%s257_s3 + $0x10] sm:$0xff] %v78_v31  ;;  %95 = vst [vmem:[%s257_s3 + $0x18] sm:$0xff] %v79_v32  ;;  %v48_v45 = vmul.f32 %v112_v1, %v25_v29  ;;  %v68_v46 = vadd.f32 %v143_v2, %v45_v40  ;;  %v49_v47 = vmul.f32 %v112_v1, %v26_v34 }
   0xb   :  { %96 = vst [vmem:[%s257_s3 + $0x20] sm:$0xff] %v80_v37  ;;  %97 = vst [vmem:[%s257_s3 + $0x28] sm:$0xff] %v81_v38  ;;  %v50_v48 = vmul.f32 %v112_v1, %v27_v35  ;;  %v51_v49 = vmul.f32 %v112_v1, %v28_v36  ;;  %v69_v50 = vadd.f32 %v143_v2, %v46_v43 }
   0xc   :  { %98 = vst [vmem:[%s257_s3 + $0x30] sm:$0xff] %v82_v39  ;;  %99 = vst [vmem:[%s257_s3 + $0x38] sm:$0xff] %v83_v42  ;;  %v70_v51 = vadd.f32 %v143_v2, %v47_v44  ;;  %v71_v52 = vadd.f32 %v143_v2, %v48_v45  ;;  %v52_v53 = vmul.f32 %v112_v1, %v29_v41  ;;  %v84_v54 = vmax.f32 %v68_v46, 0.0 }
   0xd   :  { %v72_v55 = vadd.f32 %v143_v2, %v49_v47  ;;  %v73_v56 = vadd.f32 %v143_v2, %v50_v48  ;;  %v74_v57 = vadd.f32 %v143_v2, %v51_v49  ;;  %v85_v58 = vmax.f32 %v69_v50, 0.0 }
   0xe   :  { %v86_v59 = vmax.f32 %v70_v51, 0.0  ;;  %v87_v60 = vmax.f32 %v71_v52, 0.0  ;;  %v75_v61 = vadd.f32 %v143_v2, %v52_v53  ;;  %100 = vst [vmem:[%s257_s3 + $0x40] sm:$0xff] %v84_v54 }
   0xf   :  { %v88_v62 = vmax.f32 %v72_v55, 0.0  ;;  %v89_v63 = vmax.f32 %v73_v56, 0.0  ;;  %v90_v0 = vmax.f32 %v74_v57, 0.0  ;;  %101 = vst [vmem:[%s257_s3 + $0x48] sm:$0xff] %v85_v58 }
  0x10   :  { %102 = vst [vmem:[%s257_s3 + $0x50] sm:$0xff] %v86_v59  ;;  %103 = vst [vmem:[%s257_s3 + $0x58] sm:$0xff] %v87_v60  ;;  %v91_v1 = vmax.f32 %v75_v61, 0.0 }
  0x11   :  { %104 = vst [vmem:[%s257_s3 + $0x60] sm:$0xff] %v88_v62  ;;  %105 = vst [vmem:[%s257_s3 + $0x68] sm:$0xff] %v89_v63 }
  0x12   :  { %106 = vst [vmem:[%s257_s3 + $0x70] sm:$0xff] %v90_v0  ;;  %107 = vst [vmem:[%s257_s3 + $0x78] sm:$0xff] %v91_v1 }

// kernel: basic_block_pallas.4
= control target key start
LH: loop header
LB: loop body
LE: loop exit
PB: predicated region body
PF: predicated region fallthrough
CT: control target
= control target key end

     0   :  { %vm116_vm0 = vcmask 1041408   ;;  %vm91_vm1 = vcmask 293888   ;;  %v380_v12 = vmov 0.0   ;;  %vm291_vm2 = vcmask 1040384   ;;  %s499_s1 = inlined_call_operand.vmem [shape: bf16[36,128], index: 1, kind: input, shape index: {}]   ;;  %s500_s0 = inlined_call_operand.vmem [shape: bf16[128,36], index: 0, kind: input, shape index: {}]   ;;  %s501_s3 = inlined_call_operand.vmem [shape: f32[2,128], index: 3, kind: output, shape index: {1}]   ;;  %s502_s2 = inlined_call_operand.vmem [shape: f32[128,128], index: 2, kind: output, shape index: {0}]  }
   0x1   :  { %v369_v0 = vld [vmem:[%s499_s1 + $0x10] ss:$0 sps:$4 sm:$0x33]   ;;  %v370_v1 = vld [vmem:[%s499_s1 + $0x8] sm:$0xff]   ;;  %v372_v3 = vld [vmem:[%s500_s0] sm:$0xff]   ;;  %296 = vst [vmem:[%s501_s3] sm:$0x3] %v380_v12 }
   0x2   :  { %366 = vmatprep.subr.msk.bf16.mxu0 %vm116_vm0, %v369_v0  ;;  %v118_v2 = vsel %vm116_vm0, %v369_v0, 0  ;;  %367 = vmatprep.subr.msk.bf16.mxu1 %vm116_vm0, %v369_v0  ;;  %v371_v4 = vld [vmem:[%s499_s1] sm:$0xff]   ;;  %v373_v6 = vld [vmem:[%s500_s0 + $0x8] sm:$0xff]   ;;  %v374_v8 = vld [vmem:[%s500_s0 + $0x10] sm:$0xff]  }
   0x3   :  { %339 = vmatpush3.bf16.msra.mxu0 %v118_v2  ;;  %363 = vmatpush3.bf16.msra.mxu1 %v118_v2  ;;  %v376_v5 = vld [vmem:[%s500_s0 + $0x20] sm:$0xff]   ;;  %v377_v7 = vld [vmem:[%s500_s0 + $0x28] sm:$0xff]   ;;  %v378_v9 = vld [vmem:[%s500_s0 + $0x30] sm:$0xff]  }
   0x4   :  { %340 = vmatprep.subr.bf16.mxu0 %v370_v1  ;;  %361 = vmatprep.subr.bf16.mxu1 %v370_v1  ;;  %v375_v10 = vld [vmem:[%s500_s0 + $0x18] sm:$0xff]  }
   0x5   :  { %344 = vmatprep.mubr.msk.bf16.mxu0 %vm91_vm1, %v372_v3  ;;  %352 = vmatprep.mubr.msk.bf16.mxu1 %vm91_vm1, %v376_v5  ;;  %v379_v11 = vld [vmem:[%s500_s0 + $0x38] sm:$0xff]  }
   0x7   :  { %341 = vmatpush3.bf16.msra.mxu0 %v370_v1  ;;  %364 = vmatpush3.bf16.msra.mxu1 %v370_v1 }
   0x8   :  { %342 = vmatprep.subr.bf16.mxu0 %v371_v4  ;;  %362 = vmatprep.subr.bf16.mxu1 %v371_v4 }
   0xb   :  { %343 = vmatpush3.bf16.msra.mxu0 %v371_v4  ;;  %365 = vmatpush3.bf16.msra.mxu1 %v371_v4 }
   0xe   :  { %345 = vmatmul.mubr.msk.bf16.vlgmr.msra.gmra.mxu0 %vm91_vm1, %v373_v6  ;;  %353 = vmatmul.mubr.msk.bf16.vlgmr.msra.gmra.mxu1 %vm91_vm1, %v377_v7 }
   0xf   :  { %348 = vmatprep.mubr.msk.bf16.mxu0 %vm91_vm1, %v374_v8  ;;  %356 = vmatprep.mubr.msk.bf16.mxu1 %vm91_vm1, %v378_v9 }
  0x16   :  { %349 = vmatmul.mubr.msk.bf16.gmra.mxu0 %vm91_vm1, %v375_v10  ;;  %357 = vmatmul.mubr.msk.bf16.gmra.mxu1 %vm91_vm1, %v379_v11 }
  0xce   :  { %v346_v13 = vpop.f32.mrf.mxu0  ;;  %v354_v14 = vpop.f32.mrf.mxu1 }
  0xcf   :  { %219 = vst [vmem:[%s502_s2 + $0x10] sm:$0xff] %v346_v13  ;;  %227 = vst [vmem:[%s502_s2 + $0x50] sm:$0xff] %v354_v14  ;;  %v256_v26 = vmul.f32 %v346_v13, %v346_v13  ;;  %v264_v56 = vmul.f32 %v354_v14, %v354_v14 }
  0xd0   :  { %v154_v15 = vpop.f32.mrf.mxu0  ;;  %v186_v16 = vpop.f32.mrf.mxu1 }
  0xd1   :  { %217 = vst [vmem:[%s502_s2] sm:$0xff] %v154_v15  ;;  %225 = vst [vmem:[%s502_s2 + $0x40] sm:$0xff] %v186_v16  ;;  %v254_v21 = vmul.f32 %v154_v15, %v154_v15  ;;  %v262_v50 = vmul.f32 %v186_v16, %v186_v16 }
  0xd2   :  { %v347_v17 = vpop.f32.mrf.mxu0  ;;  %v355_v18 = vpop.f32.mrf.mxu1 }
  0xd3   :  { %220 = vst [vmem:[%s502_s2 + $0x18] sm:$0xff] %v347_v17  ;;  %228 = vst [vmem:[%s502_s2 + $0x58] sm:$0xff] %v355_v18  ;;  %v257_v31 = vmul.f32 %v347_v17, %v347_v17  ;;  %v265_v59 = vmul.f32 %v355_v18, %v355_v18 }
  0xd4   :  { %v157_v19 = vpop.f32.mrf.mxu0  ;;  %v189_v20 = vpop.f32.mrf.mxu1 }
  0xd5   :  { %218 = vst [vmem:[%s502_s2 + $0x8] sm:$0xff] %v157_v19  ;;  %v233_v22 = vadd.f32 %v157_v19, %v154_v15  ;;  %v255_v23 = vmul.f32 %v157_v19, %v157_v19  ;;  %226 = vst [vmem:[%s502_s2 + $0x48] sm:$0xff] %v189_v20  ;;  %v263_v54 = vmul.f32 %v189_v20, %v189_v20 }
  0xd6   :  { %v350_v24 = vpop.f32.mrf.mxu0  ;;  %v358_v25 = vpop.f32.mrf.mxu1 }
  0xd7   :  { %v234_v27 = vadd.f32 %v346_v13, %v233_v22  ;;  %v270_v28 = vadd.f32 %v255_v23, %v254_v21  ;;  %223 = vst [vmem:[%s502_s2 + $0x30] sm:$0xff] %v350_v24  ;;  %231 = vst [vmem:[%s502_s2 + $0x70] sm:$0xff] %v358_v25  ;;  %v260_v44 = vmul.f32 %v350_v24, %v350_v24  ;;  %v297_v23 = vld [vmem:[%s501_s3] sm:$0x3] }
  0xd8   :  { %v170_v29 = vpop.f32.mrf.mxu0  ;;  %v202_v30 = vpop.f32.mrf.mxu1  ;;  %v268_v4 = vmul.f32 %v358_v25, %v358_v25 }
  0xd9   :  { %v271_v32 = vadd.f32 %v270_v28, %v256_v26  ;;  %221 = vst [vmem:[%s502_s2 + $0x20] sm:$0xff] %v170_v29  ;;  %v235_v33 = vadd.f32 %v347_v17, %v234_v27  ;;  %229 = vst [vmem:[%s502_s2 + $0x60] sm:$0xff] %v202_v30  ;;  %v258_v37 = vmul.f32 %v170_v29, %v170_v29 }
  0xda   :  { %v351_v34 = vpop.f32.mrf.mxu0  ;;  %v359_v35 = vpop.f32.mrf.mxu1  ;;  %v266_v63 = vmul.f32 %v202_v30, %v202_v30 }
  0xdb   :  { %v236_v36 = vadd.f32 %v235_v33, %v170_v29  ;;  %v272_v38 = vadd.f32 %v271_v32, %v257_v31  ;;  %224 = vst [vmem:[%s502_s2 + $0x38] sm:$0xff] %v351_v34  ;;  %232 = vst [vmem:[%s502_s2 + $0x78] sm:$0xff] %v359_v35  ;;  %v261_v47 = vmul.f32 %v351_v34, %v351_v34 }
  0xdc   :  { %v173_v39 = vpop.f32.mrf.mxu0  ;;  %v205_v40 = vpop.f32.mrf.mxu1  ;;  %v269_v7 = vmul.f32 %v359_v35, %v359_v35 }
  0xdd   :  { %v273_v41 = vadd.f32 %v272_v38, %v258_v37  ;;  %222 = vst [vmem:[%s502_s2 + $0x28] sm:$0xff] %v173_v39  ;;  %v237_v42 = vadd.f32 %v236_v36, %v173_v39  ;;  %v259_v43 = vmul.f32 %v173_v39, %v173_v39  ;;  %230 = vst [vmem:[%s502_s2 + $0x68] sm:$0xff] %v205_v40 }
  0xde   :  { %v267_v3 = vmul.f32 %v205_v40, %v205_v40 }
  0xdf   :  { %v238_v45 = vadd.f32 %v350_v24, %v237_v42  ;;  %v274_v46 = vadd.f32 %v273_v41, %v259_v43 }
  0xe1   :  { %v239_v48 = vadd.f32 %v351_v34, %v238_v45  ;;  %v275_v49 = vadd.f32 %v274_v46, %v260_v44 }
  0xe3   :  { %v276_v51 = vadd.f32 %v275_v49, %v261_v47  ;;  %v240_v52 = vadd.f32 %v239_v48, %v186_v16 }
  0xe5   :  { %v241_v53 = vadd.f32 %v240_v52, %v189_v20  ;;  %v277_v55 = vadd.f32 %v276_v51, %v262_v50 }
  0xe7   :  { %v242_v57 = vadd.f32 %v354_v14, %v241_v53  ;;  %v278_v58 = vadd.f32 %v277_v55, %v263_v54 }
  0xe9   :  { %v279_v60 = vadd.f32 %v278_v58, %v264_v56  ;;  %v243_v61 = vadd.f32 %v355_v18, %v242_v57 }
  0xeb   :  { %v244_v62 = vadd.f32 %v243_v61, %v202_v30  ;;  %v280_v0 = vadd.f32 %v279_v60, %v265_v59 }
  0xed   :  { %v281_v1 = vadd.f32 %v280_v0, %v266_v63  ;;  %v245_v2 = vadd.f32 %v244_v62, %v205_v40 }
  0xef   :  { %v246_v5 = vadd.f32 %v358_v25, %v245_v2  ;;  %v282_v6 = vadd.f32 %v281_v1, %v267_v3 }
  0xf1   :  { %v247_v8 = vadd.f32 %v359_v35, %v246_v5  ;;  %v283_v9 = vadd.f32 %v282_v6, %v268_v4 }
  0xf3   :  { %v248_v10 = vrot.slane %v247_v8, 4  ;;  %v284_v11 = vadd.f32 %v283_v9, %v269_v7 }
  0xf5   :  { %v249_v12 = vadd.f32 %v248_v10, %v247_v8  ;;  %v285_v13 = vrot.slane %v284_v11, 4 }
  0xf7   :  { %v250_v14 = vrot.slane %v249_v12, 2  ;;  %v286_v15 = vadd.f32 %v285_v13, %v284_v11 }
  0xf9   :  { %v251_v16 = vadd.f32 %v250_v14, %v249_v12  ;;  %v287_v17 = vrot.slane %v286_v15, 2 }
  0xfb   :  { %v252_v18 = vrot.slane %v251_v16, 1  ;;  %v288_v19 = vadd.f32 %v287_v17, %v286_v15 }
  0xfd   :  { %v289_v20 = vrot.slane %v288_v19, 1  ;;  %v253_v21 = vadd.f32 %v252_v18, %v251_v16 }
  0xff   :  { %v290_v22 = vadd.f32 %v289_v20, %v288_v19 }
 0x101   :  { %v292_v24 = vsel %vm291_vm2, %v253_v21, %v290_v22 }
 0x102   :  { %v298_v25 = vadd.f32 %v297_v23, %v292_v24 }
 0x104   :  { %299 = vst [vmem:[%s501_s3] sm:$0x3] %v298_v25 }

// kernel: basic_block_pallas.7
= control target key start
LH: loop header
LB: loop body
LE: loop exit
PB: predicated region body
PF: predicated region fallthrough
CT: control target
= control target key end

     0   :  { %s466_s0 = inlined_call_operand.vmem [shape: f32[128,128], index: 0, kind: input, shape index: {}]   ;;  %s467_s1 = inlined_call_operand.vmem [shape: f32[1,128], index: 1, kind: input, shape index: {}]   ;;  %s468_s2 = inlined_call_operand.vmem [shape: f32[1,128], index: 2, kind: input, shape index: {}]   ;;  %s469_s3 = inlined_call_operand.vmem [shape: f32[128,128], index: 3, kind: input, shape index: {}]   ;;  %s470_s4 = inlined_call_operand.vmem [shape: f32[1,128], index: 4, kind: input, shape index: {}]   ;;  %s471_s5 = inlined_call_operand.vmem [shape: f32[1,128], index: 5, kind: input, shape index: {}]   ;;  %s472_s6 = inlined_call_operand.vmem [shape: f32[128,128], index: 6, kind: output, shape index: {}]  }
   0x1   :  { %v23_v0 = vld [vmem:[%s466_s0] sm:$0xff]  ;;  %v24_v8 = vld [vmem:[%s466_s0 + $0x8] sm:$0xff]  ;;  %v25_v10 = vld [vmem:[%s466_s0 + $0x10] sm:$0xff] }
   0x2   :  { %v244_v1 = vld [vmem:[%s467_s1] ss:$0 sm:$0xff]  ;;  %v86_v9 = vld [vmem:[%s469_s3 + $0x8] sm:$0xff]  ;;  %v87_v15 = vld [vmem:[%s469_s3 + $0x10] sm:$0xff] }
   0x3   :  { %v249_v2 = vld [vmem:[%s468_s2] ss:$0 sm:$0xff]  ;;  %v46_v3 = vmul.f32 %v244_v1, %v23_v0  ;;  %v47_v12 = vmul.f32 %v244_v1, %v24_v8  ;;  %v48_v14 = vmul.f32 %v244_v1, %v25_v10  ;;  %v26_v16 = vld [vmem:[%s466_s0 + $0x18] sm:$0xff]  ;;  %v28_v24 = vld [vmem:[%s466_s0 + $0x28] sm:$0xff] }
   0x4   :  { %v85_v4 = vld [vmem:[%s469_s3] sm:$0xff]  ;;  %v88_v17 = vld [vmem:[%s469_s3 + $0x18] sm:$0xff]  ;;  %v49_v20 = vmul.f32 %v244_v1, %v26_v16  ;;  %v90_v29 = vld [vmem:[%s469_s3 + $0x28] sm:$0xff]  ;;  %v51_v38 = vmul.f32 %v244_v1, %v28_v24 }
   0x5   :  { %v258_v5 = vld [vmem:[%s470_s4] ss:$0 sm:$0xff]  ;;  %v69_v11 = vadd.f32 %v249_v2, %v46_v3  ;;  %v70_v25 = vadd.f32 %v249_v2, %v47_v12  ;;  %v71_v27 = vadd.f32 %v249_v2, %v48_v14  ;;  %v29_v34 = vld [vmem:[%s466_s0 + $0x30] sm:$0xff]  ;;  %v30_v44 = vld [vmem:[%s466_s0 + $0x38] sm:$0xff] }
   0x6   :  { %v263_v6 = vld [vmem:[%s471_s5] ss:$0 sm:$0xff]  ;;  %v108_v7 = vmul.f32 %v258_v5, %v85_v4  ;;  %v109_v13 = vmul.f32 %v258_v5, %v86_v9  ;;  %v110_v19 = vmul.f32 %v258_v5, %v87_v15  ;;  %v111_v21 = vmul.f32 %v258_v5, %v88_v17  ;;  %v91_v39 = vld [vmem:[%s469_s3 + $0x30] sm:$0xff]  ;;  %v92_v45 = vld [vmem:[%s469_s3 + $0x38] sm:$0xff] }
   0x7   :  { %v27_v22 = vld [vmem:[%s466_s0 + $0x20] sm:$0xff]  ;;  %v72_v32 = vadd.f32 %v249_v2, %v49_v20  ;;  %v113_v43 = vmul.f32 %v258_v5, %v90_v29  ;;  %v74_v48 = vadd.f32 %v249_v2, %v51_v38  ;;  %v52_v49 = vmul.f32 %v244_v1, %v29_v34  ;;  %v32_v56 = vld [vmem:[%s466_s0 + $0x48] sm:$0xff]  ;;  %v33_v4 = vld [vmem:[%s466_s0 + $0x50] sm:$0xff] }
   0x8   :  { %v131_v18 = vadd.f32 %v263_v6, %v108_v7  ;;  %v89_v23 = vld [vmem:[%s469_s3 + $0x20] sm:$0xff]  ;;  %v132_v26 = vadd.f32 %v263_v6, %v109_v13  ;;  %v50_v28 = vmul.f32 %v244_v1, %v27_v22  ;;  %v133_v31 = vadd.f32 %v263_v6, %v110_v19  ;;  %v94_v3 = vld [vmem:[%s469_s3 + $0x48] sm:$0xff]  ;;  %v34_v12 = vld [vmem:[%s466_s0 + $0x58] sm:$0xff] }
   0x9   :  { %v134_v33 = vadd.f32 %v263_v6, %v111_v21  ;;  %v112_v37 = vmul.f32 %v258_v5, %v89_v23  ;;  %v31_v50 = vld [vmem:[%s466_s0 + $0x40] sm:$0xff]  ;;  %v136_v54 = vadd.f32 %v263_v6, %v113_v43  ;;  %v114_v55 = vmul.f32 %v258_v5, %v91_v39  ;;  %v96_v17 = vld [vmem:[%s469_s3 + $0x58] sm:$0xff]  ;;  %v37_v34 = vld [vmem:[%s466_s0 + $0x70] sm:$0xff] }
   0xa   :  { %v147_v30 = vadd.f32 %v131_v18, %v69_v11  ;;  %v148_v35 = vadd.f32 %v132_v26, %v70_v25  ;;  %v73_v36 = vadd.f32 %v249_v2, %v50_v28  ;;  %v149_v41 = vadd.f32 %v133_v31, %v71_v27  ;;  %v93_v51 = vld [vmem:[%s469_s3 + $0x40] sm:$0xff]  ;;  %v95_v11 = vld [vmem:[%s469_s3 + $0x50] sm:$0xff]  ;;  %v36_v28 = vld [vmem:[%s466_s0 + $0x68] sm:$0xff] }
   0xb   :  { %v150_v42 = vadd.f32 %v134_v33, %v72_v32  ;;  %v135_v47 = vadd.f32 %v263_v6, %v112_v37  ;;  %v75_v58 = vadd.f32 %v249_v2, %v52_v49  ;;  %v53_v59 = vmul.f32 %v244_v1, %v30_v44  ;;  %v35_v22 = vld [vmem:[%s466_s0 + $0x60] sm:$0xff]  ;;  %v98_v33 = vld [vmem:[%s469_s3 + $0x68] sm:$0xff]  ;;  %v99_v43 = vld [vmem:[%s469_s3 + $0x70] sm:$0xff] }
   0xc   :  { %v163_v40 = vmax.f32 %v147_v30, 0.0  ;;  %v164_v46 = vmax.f32 %v148_v35, 0.0  ;;  %v165_v52 = vmax.f32 %v149_v41, 0.0  ;;  %v115_v60 = vmul.f32 %v258_v5, %v92_v45  ;;  %v97_v27 = vld [vmem:[%s469_s3 + $0x60] sm:$0xff]  ;;  %v100_v49 = vld [vmem:[%s469_s3 + $0x78] sm:$0xff] }
   0xd   :  { %v166_v53 = vmax.f32 %v150_v42, 0.0  ;;  %v151_v57 = vadd.f32 %v135_v47, %v73_v36  ;;  %v152_v61 = vadd.f32 %v136_v54, %v74_v48  ;;  %v137_v62 = vadd.f32 %v263_v6, %v114_v55  ;;  %v38_v48 = vld [vmem:[%s466_s0 + $0x78] sm:$0xff] }
   0xe   :  { %179 = vst [vmem:[%s472_s6] sm:$0xff] %v163_v40  ;;  %180 = vst [vmem:[%s472_s6 + $0x8] sm:$0xff] %v164_v46  ;;  %v54_v63 = vmul.f32 %v244_v1, %v31_v50  ;;  %v116_v0 = vmul.f32 %v258_v5, %v93_v51  ;;  %v76_v8 = vadd.f32 %v249_v2, %v53_v59 }
   0xf   :  { %181 = vst [vmem:[%s472_s6 + $0x10] sm:$0xff] %v165_v52  ;;  %182 = vst [vmem:[%s472_s6 + $0x18] sm:$0xff] %v166_v53  ;;  %v167_v7 = vmax.f32 %v151_v57, 0.0  ;;  %v138_v9 = vadd.f32 %v263_v6, %v115_v60  ;;  %v55_v10 = vmul.f32 %v244_v1, %v32_v56  ;;  %v168_v13 = vmax.f32 %v152_v61, 0.0 }
  0x10   :  { %v153_v14 = vadd.f32 %v137_v62, %v75_v58  ;;  %v77_v15 = vadd.f32 %v249_v2, %v54_v63  ;;  %v139_v16 = vadd.f32 %v263_v6, %v116_v0  ;;  %v117_v20 = vmul.f32 %v258_v5, %v94_v3 }
  0x11   :  { %183 = vst [vmem:[%s472_s6 + $0x20] sm:$0xff] %v167_v7  ;;  %v154_v18 = vadd.f32 %v138_v9, %v76_v8  ;;  %v78_v19 = vadd.f32 %v249_v2, %v55_v10  ;;  %v56_v21 = vmul.f32 %v244_v1, %v33_v4  ;;  %184 = vst [vmem:[%s472_s6 + $0x28] sm:$0xff] %v168_v13 }
  0x12   :  { %v169_v23 = vmax.f32 %v153_v14, 0.0  ;;  %v155_v24 = vadd.f32 %v139_v16, %v77_v15  ;;  %v118_v25 = vmul.f32 %v258_v5, %v95_v11  ;;  %v57_v26 = vmul.f32 %v244_v1, %v34_v12 }
  0x13   :  { %v170_v29 = vmax.f32 %v154_v18, 0.0  ;;  %v140_v30 = vadd.f32 %v263_v6, %v117_v20  ;;  %v79_v31 = vadd.f32 %v249_v2, %v56_v21  ;;  %v119_v32 = vmul.f32 %v258_v5, %v96_v17 }
  0x14   :  { %185 = vst [vmem:[%s472_s6 + $0x30] sm:$0xff] %v169_v23  ;;  %v171_v35 = vmax.f32 %v155_v24, 0.0  ;;  %v141_v36 = vadd.f32 %v263_v6, %v118_v25  ;;  %v80_v37 = vadd.f32 %v249_v2, %v57_v26  ;;  %v58_v38 = vmul.f32 %v244_v1, %v35_v22 }
  0x15   :  { %186 = vst [vmem:[%s472_s6 + $0x38] sm:$0xff] %v170_v29  ;;  %v156_v39 = vadd.f32 %v140_v30, %v78_v19  ;;  %v142_v40 = vadd.f32 %v263_v6, %v119_v32  ;;  %v120_v41 = vmul.f32 %v258_v5, %v97_v27  ;;  %v59_v42 = vmul.f32 %v244_v1, %v36_v28 }
  0x16   :  { %187 = vst [vmem:[%s472_s6 + $0x40] sm:$0xff] %v171_v35  ;;  %v157_v44 = vadd.f32 %v141_v36, %v79_v31  ;;  %v81_v45 = vadd.f32 %v249_v2, %v58_v38  ;;  %v121_v46 = vmul.f32 %v258_v5, %v98_v33  ;;  %v60_v47 = vmul.f32 %v244_v1, %v37_v34 }
  0x17   :  { %v172_v50 = vmax.f32 %v156_v39, 0.0  ;;  %v158_v51 = vadd.f32 %v142_v40, %v80_v37  ;;  %v143_v52 = vadd.f32 %v263_v6, %v120_v41  ;;  %v82_v53 = vadd.f32 %v249_v2, %v59_v42 }
  0x18   :  { %v173_v54 = vmax.f32 %v157_v44, 0.0  ;;  %v144_v55 = vadd.f32 %v263_v6, %v121_v46  ;;  %v83_v56 = vadd.f32 %v249_v2, %v60_v47  ;;  %v122_v57 = vmul.f32 %v258_v5, %v99_v43 }
  0x19   :  { %188 = vst [vmem:[%s472_s6 + $0x48] sm:$0xff] %v172_v50  ;;  %v174_v58 = vmax.f32 %v158_v51, 0.0  ;;  %v159_v59 = vadd.f32 %v143_v52, %v81_v45  ;;  %v61_v60 = vmul.f32 %v244_v1, %v38_v48  ;;  %v123_v61 = vmul.f32 %v258_v5, %v100_v49 }
  0x1a   :  { %189 = vst [vmem:[%s472_s6 + $0x50] sm:$0xff] %v173_v54  ;;  %v160_v62 = vadd.f32 %v144_v55, %v82_v53  ;;  %v145_v63 = vadd.f32 %v263_v6, %v122_v57 }
  0x1b   :  { %190 = vst [vmem:[%s472_s6 + $0x58] sm:$0xff] %v174_v58  ;;  %v175_v0 = vmax.f32 %v159_v59, 0.0  ;;  %v84_v3 = vadd.f32 %v249_v2, %v61_v60  ;;  %v146_v4 = vadd.f32 %v263_v6, %v123_v61 }
  0x1c   :  { %v176_v7 = vmax.f32 %v160_v62, 0.0  ;;  %v161_v1 = vadd.f32 %v145_v63, %v83_v56 }
  0x1d   :  { %191 = vst [vmem:[%s472_s6 + $0x60] sm:$0xff] %v175_v0  ;;  %v162_v5 = vadd.f32 %v146_v4, %v84_v3 }
  0x1e   :  { %192 = vst [vmem:[%s472_s6 + $0x68] sm:$0xff] %v176_v7  ;;  %v177_v8 = vmax.f32 %v161_v1, 0.0 }
  0x1f   :  { %v178_v9 = vmax.f32 %v162_v5, 0.0 }
  0x20   :  { %193 = vst [vmem:[%s472_s6 + $0x70] sm:$0xff] %v177_v8 }
  0x21   :  { %194 = vst [vmem:[%s472_s6 + $0x78] sm:$0xff] %v178_v9 }

// kernel: basic_block_pallas.6
= control target key start
LH: loop header
LB: loop body
LE: loop exit
PB: predicated region body
PF: predicated region fallthrough
CT: control target
= control target key end

     0   :  { %vm406_vm0 = vcmask 1041408   ;;  %vm140_vm1 = vcmask 1043456   ;;  %vm381_vm2 = vcmask 31744   ;;  %vm115_vm3 = vcmask 588800   ;;  %s971_s3 = inlined_call_operand.vmem [shape: bf16[4,128], index: 3, kind: input, shape index: {}]   ;;  %s972_s1 = inlined_call_operand.vmem [shape: bf16[72,128], index: 1, kind: input, shape index: {}]   ;;  %s973_s2 = inlined_call_operand.vmem [shape: bf16[128,4], index: 2, kind: input, shape index: {}]   ;;  %s974_s0 = inlined_call_operand.vmem [shape: bf16[128,72], index: 0, kind: input, shape index: {}]   ;;  %s975_s7 = inlined_call_operand.vmem [shape: f32[2,128], index: 7, kind: output, shape index: {3}]   ;;  %s976_s5 = inlined_call_operand.vmem [shape: f32[2,128], index: 5, kind: output, shape index: {1}]   ;;  %s977_s6 = inlined_call_operand.vmem [shape: f32[128,128], index: 6, kind: output, shape index: {2}]   ;;  %s978_s4 = inlined_call_operand.vmem [shape: f32[128,128], index: 4, kind: output, shape index: {0}]  }
   0x1   :  { %v340_v0 = vld [vmem:[%s971_s3] sm:$0x3]  ;;  %v713_v5 = vld [vmem:[%s973_s2 + $0x8] sm:$0xff]   ;;  %v714_v6 = vld [vmem:[%s972_s1 + $0x18] sm:$0xff]   ;;  %v732_v24 = vmov 0.0   ;;  %vm315_vm4 = vcmask 1040384  }
   0x2   :  { %v711_v1 = vld [vmem:[%s972_s1 + $0x20] ss:$0 sps:$4 sm:$0xff]   ;;  %709 = vmatprep.subr.msk.bf16.mxu1 %vm406_vm0, %v340_v0  ;;  %v408_v2 = vsel %vm406_vm0, %v340_v0, 0  ;;  %v715_v7 = vld [vmem:[%s972_s1 + $0x10] sm:$0xff]   ;;  %v718_v9 = vld [vmem:[%s972_s1 + $0x8] sm:$0xff]   ;;  %585 = vst [vmem:[%s975_s7] sm:$0x3] %v732_v24 }
   0x3   :  { %v712_v3 = vld [vmem:[%s973_s2] sm:$0xff]   ;;  %691 = vmatpush3.bf16.msra.mxu1 %v408_v2  ;;  %708 = vmatprep.subr.msk.bf16.mxu0 %vm140_vm1, %v711_v1  ;;  %v142_v4 = vsel %vm140_vm1, %v711_v1, 0  ;;  %v716_v8 = vld [vmem:[%s973_s2 + $0x10] sm:$0xff]   ;;  %v717_v10 = vld [vmem:[%s973_s2 + $0x18] sm:$0xff]   ;;  %320 = vst [vmem:[%s976_s5] sm:$0x3] %v732_v24 }
   0x4   :  { %665 = vmatpush3.bf16.msra.mxu0 %v142_v4  ;;  %692 = vmatprep.mubr.msk.bf16.mxu1 %vm381_vm2, %v712_v3  ;;  %v720_v11 = vld [vmem:[%s973_s2 + $0x20] sm:$0xff]   ;;  %v721_v14 = vld [vmem:[%s973_s2 + $0x28] sm:$0xff]   ;;  %v724_v16 = vld [vmem:[%s973_s2 + $0x30] sm:$0xff]  }
   0x5   :  { %666 = vmatprep.subr.bf16.mxu0 %v714_v6  ;;  %v722_v12 = vld [vmem:[%s974_s0] sm:$0xff]   ;;  %v723_v15 = vld [vmem:[%s974_s0 + $0x8] sm:$0xff]   ;;  %v726_v17 = vld [vmem:[%s974_s0 + $0x10] sm:$0xff]  }
   0x6   :  { %693 = vmatmul.mubr.msk.bf16.vlgmr.msra.gmra.mxu1 %vm381_vm2, %v713_v5  ;;  %v719_v13 = vld [vmem:[%s972_s1] sm:$0xff]   ;;  %674 = vmatprep.mubr.msk.bf16.mxu0 %vm115_vm3, %v722_v12  ;;  %v725_v18 = vld [vmem:[%s973_s2 + $0x38] sm:$0xff]   ;;  %v729_v21 = vld [vmem:[%s974_s0 + $0x28] sm:$0xff]  }
   0x7   :  { %696 = vmatprep.mubr.msk.bf16.mxu1 %vm381_vm2, %v716_v8  ;;  %v727_v19 = vld [vmem:[%s974_s0 + $0x18] sm:$0xff]   ;;  %v728_v20 = vld [vmem:[%s974_s0 + $0x20] sm:$0xff]   ;;  %v730_v22 = vld [vmem:[%s974_s0 + $0x30] sm:$0xff]  }
   0x8   :  { %667 = vmatpush3.bf16.msra.mxu0 %v714_v6  ;;  %v731_v23 = vld [vmem:[%s974_s0 + $0x38] sm:$0xff]  }
   0x9   :  { %668 = vmatprep.subr.bf16.mxu0 %v715_v7 }
   0xc   :  { %669 = vmatpush3.bf16.msra.mxu0 %v715_v7 }
   0xd   :  { %670 = vmatprep.subr.bf16.mxu0 %v718_v9 }
   0xe   :  { %697 = vmatmul.mubr.msk.bf16.gmra.mxu1 %vm381_vm2, %v717_v10 }
   0xf   :  { %700 = vmatprep.mubr.msk.bf16.mxu1 %vm381_vm2, %v720_v11 }
  0x10   :  { %671 = vmatpush3.bf16.msra.mxu0 %v718_v9 }
  0x11   :  { %672 = vmatprep.subr.bf16.mxu0 %v719_v13 }
  0x14   :  { %673 = vmatpush3.bf16.msra.mxu0 %v719_v13 }
  0x16   :  { %701 = vmatmul.mubr.msk.bf16.gmra.mxu1 %vm381_vm2, %v721_v14 }
  0x17   :  { %675 = vmatmul.mubr.msk.bf16.vlgmr.msra.gmra.mxu0 %vm115_vm3, %v723_v15  ;;  %704 = vmatprep.mubr.msk.bf16.mxu1 %vm381_vm2, %v724_v16 }
  0x18   :  { %678 = vmatprep.mubr.msk.bf16.mxu0 %vm115_vm3, %v726_v17 }
  0x1e   :  { %705 = vmatmul.mubr.msk.bf16.gmra.mxu1 %vm381_vm2, %v725_v18 }
  0x1f   :  { %679 = vmatmul.mubr.msk.bf16.gmra.mxu0 %vm115_vm3, %v727_v19 }
  0x20   :  { %682 = vmatprep.mubr.msk.bf16.mxu0 %vm115_vm3, %v728_v20 }
  0x27   :  { %683 = vmatmul.mubr.msk.bf16.gmra.mxu0 %vm115_vm3, %v729_v21 }
  0x28   :  { %686 = vmatprep.mubr.msk.bf16.mxu0 %vm115_vm3, %v730_v22 }
  0x2f   :  { %687 = vmatmul.mubr.msk.bf16.gmra.mxu0 %vm115_vm3, %v731_v23 }
  0xc6   :  { %v694_v25 = vpop.f32.mrf.mxu1 }
  0xc7   :  { %509 = vst [vmem:[%s977_s6 + $0x10] sm:$0xff] %v694_v25  ;;  %v546_v30 = vmul.f32 %v694_v25, %v694_v25 }
  0xc8   :  { %v444_v26 = vpop.f32.mrf.mxu1 }
  0xc9   :  { %507 = vst [vmem:[%s977_s6] sm:$0xff] %v444_v26  ;;  %v544_v28 = vmul.f32 %v444_v26, %v444_v26 }
  0xca   :  { %v695_v27 = vpop.f32.mrf.mxu1 }
  0xcb   :  { %510 = vst [vmem:[%s977_s6 + $0x18] sm:$0xff] %v695_v27  ;;  %v547_v34 = vmul.f32 %v695_v27, %v695_v27 }
  0xcc   :  { %v447_v29 = vpop.f32.mrf.mxu1 }
  0xcd   :  { %508 = vst [vmem:[%s977_s6 + $0x8] sm:$0xff] %v447_v29  ;;  %v523_v31 = vadd.f32 %v447_v29, %v444_v26  ;;  %v545_v32 = vmul.f32 %v447_v29, %v447_v29 }
  0xce   :  { %v698_v33 = vpop.f32.mrf.mxu1 }
  0xcf   :  { %v524_v35 = vadd.f32 %v694_v25, %v523_v31  ;;  %v560_v36 = vadd.f32 %v545_v32, %v544_v28  ;;  %513 = vst [vmem:[%s977_s6 + $0x30] sm:$0xff] %v698_v33  ;;  %v550_v45 = vmul.f32 %v698_v33, %v698_v33 }
  0xd0   :  { %v460_v37 = vpop.f32.mrf.mxu1 }
  0xd1   :  { %v561_v38 = vadd.f32 %v560_v36, %v546_v30  ;;  %511 = vst [vmem:[%s977_s6 + $0x20] sm:$0xff] %v460_v37  ;;  %v525_v39 = vadd.f32 %v695_v27, %v524_v35  ;;  %v548_v40 = vmul.f32 %v460_v37, %v460_v37 }
  0xd2   :  { %v699_v41 = vpop.f32.mrf.mxu1 }
  0xd3   :  { %v526_v42 = vadd.f32 %v525_v39, %v460_v37  ;;  %v562_v43 = vadd.f32 %v561_v38, %v547_v34  ;;  %514 = vst [vmem:[%s977_s6 + $0x38] sm:$0xff] %v699_v41  ;;  %v551_v50 = vmul.f32 %v699_v41, %v699_v41 }
  0xd4   :  { %v463_v44 = vpop.f32.mrf.mxu1 }
  0xd5   :  { %v563_v46 = vadd.f32 %v562_v43, %v548_v40  ;;  %512 = vst [vmem:[%s977_s6 + $0x28] sm:$0xff] %v463_v44  ;;  %v527_v47 = vadd.f32 %v526_v42, %v463_v44  ;;  %v549_v48 = vmul.f32 %v463_v44, %v463_v44 }
  0xd6   :  { %v702_v49 = vpop.f32.mrf.mxu1 }
  0xd7   :  { %v528_v51 = vadd.f32 %v698_v33, %v527_v47  ;;  %v564_v52 = vadd.f32 %v563_v46, %v549_v48  ;;  %517 = vst [vmem:[%s977_s6 + $0x50] sm:$0xff] %v702_v49  ;;  %v676_v53 = vpop.f32.mrf.mxu0  ;;  %v554_v0 = vmul.f32 %v702_v49, %v702_v49 }
  0xd8   :  { %243 = vst [vmem:[%s978_s4 + $0x10] sm:$0xff] %v676_v53  ;;  %v476_v54 = vpop.f32.mrf.mxu1  ;;  %v280_v13 = vmul.f32 %v676_v53, %v676_v53 }
  0xd9   :  { %v565_v55 = vadd.f32 %v564_v52, %v550_v45  ;;  %515 = vst [vmem:[%s977_s6 + $0x40] sm:$0xff] %v476_v54  ;;  %v529_v56 = vadd.f32 %v699_v41, %v528_v51  ;;  %v552_v57 = vmul.f32 %v476_v54, %v476_v54  ;;  %v178_v58 = vpop.f32.mrf.mxu0 }
  0xda   :  { %241 = vst [vmem:[%s978_s4] sm:$0xff] %v178_v58  ;;  %v703_v59 = vpop.f32.mrf.mxu1  ;;  %v278_v5 = vmul.f32 %v178_v58, %v178_v58 }
  0xdb   :  { %v530_v60 = vadd.f32 %v529_v56, %v476_v54  ;;  %v566_v61 = vadd.f32 %v565_v55, %v551_v50  ;;  %518 = vst [vmem:[%s977_s6 + $0x58] sm:$0xff] %v703_v59  ;;  %v677_v62 = vpop.f32.mrf.mxu0  ;;  %v555_v9 = vmul.f32 %v703_v59, %v703_v59 }
  0xdc   :  { %244 = vst [vmem:[%s978_s4 + $0x18] sm:$0xff] %v677_v62  ;;  %v479_v63 = vpop.f32.mrf.mxu1  ;;  %v281_v21 = vmul.f32 %v677_v62, %v677_v62 }
  0xdd   :  { %v567_v1 = vadd.f32 %v566_v61, %v552_v57  ;;  %516 = vst [vmem:[%s977_s6 + $0x48] sm:$0xff] %v479_v63  ;;  %v531_v2 = vadd.f32 %v530_v60, %v479_v63  ;;  %v553_v3 = vmul.f32 %v479_v63, %v479_v63  ;;  %v181_v4 = vpop.f32.mrf.mxu0 }
  0xde   :  { %242 = vst [vmem:[%s978_s4 + $0x8] sm:$0xff] %v181_v4  ;;  %v257_v6 = vadd.f32 %v181_v4, %v178_v58  ;;  %v279_v7 = vmul.f32 %v181_v4, %v181_v4  ;;  %v706_v8 = vpop.f32.mrf.mxu1 }
  0xdf   :  { %v532_v10 = vadd.f32 %v702_v49, %v531_v2  ;;  %v568_v11 = vadd.f32 %v567_v1, %v553_v3  ;;  %521 = vst [vmem:[%s977_s6 + $0x70] sm:$0xff] %v706_v8  ;;  %v680_v12 = vpop.f32.mrf.mxu0  ;;  %v558_v32 = vmul.f32 %v706_v8, %v706_v8 }
  0xe0   :  { %v258_v14 = vadd.f32 %v676_v53, %v257_v6  ;;  %v294_v15 = vadd.f32 %v279_v7, %v278_v5  ;;  %247 = vst [vmem:[%s978_s4 + $0x30] sm:$0xff] %v680_v12  ;;  %v492_v16 = vpop.f32.mrf.mxu1  ;;  %v284_v44 = vmul.f32 %v680_v12, %v680_v12 }
  0xe1   :  { %v569_v17 = vadd.f32 %v568_v11, %v554_v0  ;;  %519 = vst [vmem:[%s977_s6 + $0x60] sm:$0xff] %v492_v16  ;;  %v533_v18 = vadd.f32 %v703_v59, %v532_v10  ;;  %v556_v19 = vmul.f32 %v492_v16, %v492_v16  ;;  %v194_v20 = vpop.f32.mrf.mxu0 }
  0xe2   :  { %v295_v22 = vadd.f32 %v294_v15, %v280_v13  ;;  %245 = vst [vmem:[%s978_s4 + $0x20] sm:$0xff] %v194_v20  ;;  %v259_v23 = vadd.f32 %v677_v62, %v258_v14  ;;  %v707_v24 = vpop.f32.mrf.mxu1  ;;  %v282_v29 = vmul.f32 %v194_v20, %v194_v20 }
  0xe3   :  { %v534_v25 = vadd.f32 %v533_v18, %v492_v16  ;;  %v570_v26 = vadd.f32 %v569_v17, %v555_v9  ;;  %522 = vst [vmem:[%s977_s6 + $0x78] sm:$0xff] %v707_v24  ;;  %v681_v27 = vpop.f32.mrf.mxu0  ;;  %v559_v40 = vmul.f32 %v707_v24, %v707_v24 }
  0xe4   :  { %v260_v28 = vadd.f32 %v259_v23, %v194_v20  ;;  %v296_v30 = vadd.f32 %v295_v22, %v281_v21  ;;  %248 = vst [vmem:[%s978_s4 + $0x38] sm:$0xff] %v681_v27  ;;  %v495_v31 = vpop.f32.mrf.mxu1  ;;  %v285_v50 = vmul.f32 %v681_v27, %v681_v27 }
  0xe5   :  { %v571_v33 = vadd.f32 %v570_v26, %v556_v19  ;;  %520 = vst [vmem:[%s977_s6 + $0x68] sm:$0xff] %v495_v31  ;;  %v535_v34 = vadd.f32 %v534_v25, %v495_v31  ;;  %v557_v35 = vmul.f32 %v495_v31, %v495_v31  ;;  %v197_v36 = vpop.f32.mrf.mxu0  ;;  %v586_v26 = vld [vmem:[%s975_s7] sm:$0x3] }
  0xe6   :  { %v297_v37 = vadd.f32 %v296_v30, %v282_v29  ;;  %246 = vst [vmem:[%s978_s4 + $0x28] sm:$0xff] %v197_v36  ;;  %v261_v38 = vadd.f32 %v260_v28, %v197_v36  ;;  %v283_v39 = vmul.f32 %v197_v36, %v197_v36 }
  0xe7   :  { %v536_v41 = vadd.f32 %v706_v8, %v535_v34  ;;  %v572_v42 = vadd.f32 %v571_v33, %v557_v35  ;;  %v684_v43 = vpop.f32.mrf.mxu0 }
  0xe8   :  { %v262_v45 = vadd.f32 %v680_v12, %v261_v38  ;;  %v298_v46 = vadd.f32 %v297_v37, %v283_v39  ;;  %251 = vst [vmem:[%s978_s4 + $0x50] sm:$0xff] %v684_v43  ;;  %v288_v4 = vmul.f32 %v684_v43, %v684_v43 }
  0xe9   :  { %v537_v47 = vadd.f32 %v707_v24, %v536_v41  ;;  %v573_v48 = vadd.f32 %v572_v42, %v558_v32  ;;  %v210_v49 = vpop.f32.mrf.mxu0 }
  0xea   :  { %v299_v51 = vadd.f32 %v298_v46, %v284_v44  ;;  %249 = vst [vmem:[%s978_s4 + $0x40] sm:$0xff] %v210_v49  ;;  %v263_v52 = vadd.f32 %v681_v27, %v262_v45  ;;  %v286_v57 = vmul.f32 %v210_v49, %v210_v49 }
  0xeb   :  { %v538_v53 = vrot.slane %v537_v47, 4  ;;  %v574_v54 = vadd.f32 %v573_v48, %v559_v40  ;;  %v685_v55 = vpop.f32.mrf.mxu0  ;;  %v321_v48 = vld [vmem:[%s976_s5] sm:$0x3] }
  0xec   :  { %v264_v56 = vadd.f32 %v263_v52, %v210_v49  ;;  %v300_v58 = vadd.f32 %v299_v51, %v285_v50  ;;  %252 = vst [vmem:[%s978_s4 + $0x58] sm:$0xff] %v685_v55  ;;  %v289_v10 = vmul.f32 %v685_v55, %v685_v55 }
  0xed   :  { %v539_v59 = vadd.f32 %v538_v53, %v537_v47  ;;  %v575_v60 = vrot.slane %v574_v54, 4  ;;  %v213_v61 = vpop.f32.mrf.mxu0 }
  0xee   :  { %v301_v62 = vadd.f32 %v300_v58, %v286_v57  ;;  %250 = vst [vmem:[%s978_s4 + $0x48] sm:$0xff] %v213_v61  ;;  %v265_v63 = vadd.f32 %v264_v56, %v213_v61  ;;  %v287_v0 = vmul.f32 %v213_v61, %v213_v61 }
  0xef   :  { %v540_v1 = vrot.slane %v539_v59, 2  ;;  %v576_v2 = vadd.f32 %v575_v60, %v574_v54  ;;  %v688_v3 = vpop.f32.mrf.mxu0 }
  0xf0   :  { %v266_v5 = vadd.f32 %v684_v43, %v265_v63  ;;  %v302_v6 = vadd.f32 %v301_v62, %v287_v0  ;;  %255 = vst [vmem:[%s978_s4 + $0x70] sm:$0xff] %v688_v3  ;;  %v292_v27 = vmul.f32 %v688_v3, %v688_v3 }
  0xf1   :  { %v541_v7 = vadd.f32 %v540_v1, %v539_v59  ;;  %v577_v8 = vrot.slane %v576_v2, 2  ;;  %v226_v9 = vpop.f32.mrf.mxu0 }
  0xf2   :  { %v303_v11 = vadd.f32 %v302_v6, %v288_v4  ;;  %253 = vst [vmem:[%s978_s4 + $0x60] sm:$0xff] %v226_v9  ;;  %v267_v12 = vadd.f32 %v685_v55, %v266_v5  ;;  %v290_v17 = vmul.f32 %v226_v9, %v226_v9 }
  0xf3   :  { %v542_v13 = vrot.slane %v541_v7, 1  ;;  %v578_v14 = vadd.f32 %v577_v8, %v576_v2  ;;  %v689_v15 = vpop.f32.mrf.mxu0 }
  0xf4   :  { %v268_v16 = vadd.f32 %v267_v12, %v226_v9  ;;  %v304_v18 = vadd.f32 %v303_v11, %v289_v10  ;;  %256 = vst [vmem:[%s978_s4 + $0x78] sm:$0xff] %v689_v15  ;;  %v293_v32 = vmul.f32 %v689_v15, %v689_v15 }
  0xf5   :  { %v543_v19 = vadd.f32 %v542_v13, %v541_v7  ;;  %v579_v20 = vrot.slane %v578_v14, 1  ;;  %v229_v21 = vpop.f32.mrf.mxu0 }
  0xf6   :  { %v305_v22 = vadd.f32 %v304_v18, %v290_v17  ;;  %254 = vst [vmem:[%s978_s4 + $0x68] sm:$0xff] %v229_v21  ;;  %v269_v23 = vadd.f32 %v268_v16, %v229_v21  ;;  %v291_v24 = vmul.f32 %v229_v21, %v229_v21 }
  0xf7   :  { %v580_v25 = vadd.f32 %v579_v20, %v578_v14 }
  0xf8   :  { %v270_v28 = vadd.f32 %v688_v3, %v269_v23  ;;  %v306_v29 = vadd.f32 %v305_v22, %v291_v24 }
  0xf9   :  { %v581_v30 = vsel %vm315_vm4, %v543_v19, %v580_v25 }
  0xfa   :  { %v587_v31 = vadd.f32 %v586_v26, %v581_v30  ;;  %v271_v33 = vadd.f32 %v689_v15, %v270_v28  ;;  %v307_v34 = vadd.f32 %v306_v29, %v292_v27 }
  0xfc   :  { %588 = vst [vmem:[%s975_s7] sm:$0x3] %v587_v31  ;;  %v272_v35 = vrot.slane %v271_v33, 4  ;;  %v308_v36 = vadd.f32 %v307_v34, %v293_v32 }
  0xfe   :  { %v273_v37 = vadd.f32 %v272_v35, %v271_v33  ;;  %v309_v38 = vrot.slane %v308_v36, 4 }
 0x100   :  { %v274_v39 = vrot.slane %v273_v37, 2  ;;  %v310_v40 = vadd.f32 %v309_v38, %v308_v36 }
 0x102   :  { %v275_v41 = vadd.f32 %v274_v39, %v273_v37  ;;  %v311_v42 = vrot.slane %v310_v40, 2 }
 0x104   :  { %v276_v43 = vrot.slane %v275_v41, 1  ;;  %v312_v44 = vadd.f32 %v311_v42, %v310_v40 }
 0x106   :  { %v313_v45 = vrot.slane %v312_v44, 1  ;;  %v277_v46 = vadd.f32 %v276_v43, %v275_v41 }
 0x108   :  { %v314_v47 = vadd.f32 %v313_v45, %v312_v44 }
 0x10a   :  { %v316_v49 = vsel %vm315_vm4, %v277_v46, %v314_v47 }
 0x10b   :  { %v322_v50 = vadd.f32 %v321_v48, %v316_v49 }
 0x10d   :  { %323 = vst [vmem:[%s976_s5] sm:$0x3] %v322_v50 }

</bundles_post_ra>
